<compile_context>
chip_gen: v5e
topology: v5e:2x2
jax: 0.10.0
libtpu: 0.0.40
codegen_flags: <defaults>
</compile_context>

<pallas_src>
from dataclasses import dataclass
from typing import Optional, Tuple

import jax
import jax.numpy as jnp
from jax.experimental import pallas as pl
from jax.experimental.pallas import tpu as pltpu

_LANE = 128
_MIN_SPLIT_ROWS = 256                   # only split the batch grid when each step gets >= this
_VMEM_SOFT_BUDGET = 40 * 1024 * 1024    # keep tiles comfortably inside v7x's 64 MiB / TC
_VMEM_LIMIT_CAP = 56 * 1024 * 1024


def _round_up(n: int, m: int) -> int:
    return ((n + m - 1) // m) * m


# --------------------------------------------------------------------------- #
# Kernel
# --------------------------------------------------------------------------- #
def _make_mlp_kernel(n_layers: int, activation: str, mxu_dtype):
    """Fused MLP kernel for a fixed layer count / activation / MXU operand dtype."""

    def _act(h):
        if activation == "ReLU":
            return jnp.maximum(h, 0.0)
        if activation == "Tanh":
            return jnp.tanh(h)
        if activation == "ELU":
            # alpha = 1 (torch default); expm1 for precision near zero.
            return jnp.where(h > 0, h, jnp.expm1(h))
        # TODO(synk): add more torch.nn activation mappings if needed.
        raise ValueError(f"unsupported activation: {activation}")

    def kernel(x_ref, *refs):
        # refs = (w_0..w_{L-1}, b_0..b_{L-1}, out_ref)
        w_refs = refs[:n_layers]
        b_refs = refs[n_layers: 2 * n_layers]
        o_ref = refs[2 * n_layers]

        h = x_ref[...].astype(jnp.float32)        # VPU/EUP math stays f32 (v5e-safe)
        for i in range(n_layers):
            lhs = h if mxu_dtype is None else h.astype(mxu_dtype)   # MXU operands only
            h = jnp.dot(lhs, w_refs[i][...], preferred_element_type=jnp.float32)
            h = h + b_refs[i][...].astype(jnp.float32)
            if i < n_layers - 1:                  # final Linear has no activation
                h = _act(h)
        o_ref[...] = h.astype(o_ref.dtype)

    return kernel


# --------------------------------------------------------------------------- #
# One-time parameter preparation (hoisted out of the forward)
# --------------------------------------------------------------------------- #
@dataclass(frozen=True)
class TaskNetMuParams:
    weights: Tuple[jax.Array, ...]
    biases: Tuple[jax.Array, ...]
    activation: str
    in_dim: int
    out_dim: int
    mxu_dtype: Optional[jnp.dtype]


def prepare_task_net_mu_params(weights, biases, activation: str, *, mxu_dtype=None):
    """Prepare params ONCE (cache & reuse the result across forward calls).

    * Hidden feature dims are zero-padded to multiples of 128 (lane-dense
      intermediates; exact for ReLU/Tanh/ELU).  Input/output dims stay natural
      so the kernel streams activations at their true HBM width.
    * Optionally casts weights to `mxu_dtype` (bf16 recommended on v6e/v7x);
      biases stay f32 and matmuls accumulate in f32.
    """
    n = len(weights)
    dims = [int(weights[0].shape[0])] + [int(w.shape[1]) for w in weights]
    dims_p = [dims[0]] + [_round_up(d, _LANE) for d in dims[1:-1]] + [dims[-1]]

    w_p, b_p = [], []
    for i in range(n):
        w, b = weights[i], biases[i]
        pad_in, pad_out = dims_p[i] - dims[i], dims_p[i + 1] - dims[i + 1]
        if pad_in or pad_out:                      # skipped entirely when aligned
            w = jnp.pad(w, ((0, pad_in), (0, pad_out)))
            b = jnp.pad(b, ((0, 0), (0, pad_out)))
        if mxu_dtype is not None:
            w = w.astype(mxu_dtype)
        w_p.append(w)
        b_p.append(b.astype(jnp.float32))
    return TaskNetMuParams(tuple(w_p), tuple(b_p), activation,
                           dims[0], dims[-1], mxu_dtype)


# --------------------------------------------------------------------------- #
# Forward
# --------------------------------------------------------------------------- #
def _choose_batch_tile(B: int, block_b: int, vmem_ok):
    """Pick (blk, padded_B)."""
    if B < 2 * _MIN_SPLIT_ROWS:
        # Single grid step (grid is a sequential loop on v5e/v6e; splitting a
        # small batch only adds ~0.35us/step + DMA setup, and gives v7x's two
        # TCs too little work each to matter).  blk == full batch dim is legal.
        return B, B
    # >= 2 grid steps, each a multiple of 256 rows (full MXU height on every
    # generation: 128-tall v5e, 256-tall v6e/v7x), capped by block_b and VMEM.
    max_blk = min(block_b, _round_up(pl.cdiv(B, 2), 256))
    blk = max(256, (max_blk // 256) * 256)
    while blk > 256 and not vmem_ok(blk):
        blk -= 256
    return blk, _round_up(B, blk)


_SINGLE_BUFFER_WEIGHTS_OK = None   # lazily resolved: does pl.Buffered(1) lower here?


def task_net_mu_forward(x, params: TaskNetMuParams, *, block_b: int = 1024):
    """Fused TaskNetMu forward: one pallas_call over a 1-D 'parallel' batch grid."""
    global _SINGLE_BUFFER_WEIGHTS_OK

    n_layers = len(params.weights)
    B, in_dim = x.shape
    assert in_dim == params.in_dim, (in_dim, params.in_dim)
    out_dim = params.out_dim
    x_item = jnp.dtype(x.dtype).itemsize

    param_bytes = sum(int(w.size) * w.dtype.itemsize for w in params.weights)
    param_bytes += sum(int(b.size) * b.dtype.itemsize for b in params.biases)
    feat_max = max([in_dim, out_dim] + [int(w.shape[1]) for w in params.weights])

    def vmem_ok(blk):
        act = 2 * blk * (in_dim + out_dim) * x_item   # double-buffered x / out tiles
        inter = 2 * blk * feat_max * 4                # f32 intermediates between layers
        return act + 2 * param_bytes + inter <= _VMEM_SOFT_BUDGET

    blk, B_pad = _choose_batch_tile(B, block_b, vmem_ok)
    grid = (B_pad // blk,)

    if B_pad != B:                       # guarded: aligned batches do zero extra copies
        x = jnp.pad(x, ((0, B_pad - B), (0, 0)))

    vmem_need = (2 * blk * (in_dim + out_dim) * x_item + 2 * param_bytes
                 + 2 * blk * feat_max * 4)
    vmem_limit = int(min(_VMEM_LIMIT_CAP, max(vmem_need + (4 << 20), 16 << 20)))

    # Advisory cost hint (tiny / HBM-bound kernel).
    dims_seq = [in_dim] + [int(w.shape[1]) for w in params.weights]
    flops = 2 * B_pad * sum(dims_seq[i] * dims_seq[i + 1] for i in range(n_layers))
    transcendentals = (B_pad * sum(dims_seq[1:-1])
                       if params.activation in ("Tanh", "ELU") else 0)
    bytes_accessed = B_pad * (in_dim + out_dim) * x_item + param_bytes
    cost = pl.CostEstimate(flops=flops, transcendentals=transcendentals,
                           bytes_accessed=bytes_accessed)

    kernel = _make_mlp_kernel(n_layers, params.activation, params.mxu_dtype)
    out_shape = jax.ShapeDtypeStruct((B_pad, out_dim), x.dtype)
    compiler_params = pltpu.CompilerParams(dimension_semantics=("parallel",),
                                           vmem_limit_bytes=vmem_limit)

    def build(single_buffer_weights: bool):
        # Weights/biases: constant (0,0) index map -> VMEM-resident across all
        # grid steps; single-buffer them when the runtime supports Buffered(1).
        pm = pl.Buffered(1) if single_buffer_weights else None
        in_specs = [pl.BlockSpec((blk, in_dim), lambda i: (i, 0))]
        for w in params.weights:
            in_specs.append(pl.BlockSpec(w.shape, lambda i: (0, 0), pipeline_mode=pm))
        for b in params.biases:
            in_specs.append(pl.BlockSpec(b.shape, lambda i: (0, 0), pipeline_mode=pm))
        out_specs = pl.BlockSpec((blk, out_dim), lambda i: (i, 0))
        return pl.pallas_call(
            kernel,
            out_shape=out_shape,
            grid_spec=pl.GridSpec(grid=grid, in_specs=in_specs, out_specs=out_specs),
            compiler_params=compiler_params,
            cost_estimate=cost,
        )

    args = (x, *params.weights, *params.biases)
    if _SINGLE_BUFFER_WEIGHTS_OK is None:
        try:
            out = build(True)(*args)
            _SINGLE_BUFFER_WEIGHTS_OK = True
        except Exception:
            # This jax/Mosaic version rejects Buffered(1); fall back to the
            # default double-buffered (still tiny) constant weight blocks.
            out = build(False)(*args)
            _SINGLE_BUFFER_WEIGHTS_OK = False
    else:
        out = build(_SINGLE_BUFFER_WEIGHTS_OK)(*args)

    if B_pad != B:                       # guarded: aligned batches do zero extra copies
        out = out[:B]
    return out


# --------------------------------------------------------------------------- #
# Init + reference
# --------------------------------------------------------------------------- #
def init_task_net_mu_params(key, ltd: int, lsd: int, num_hidden, dtype=jnp.float32):
    """Deterministic init mimicking torch.nn.Linear (uniform +-1/sqrt(fan_in)).

    Returns weights transposed to (in, out) and biases as (1, out).
    """
    in_dim = ltd // 2
    dims = [in_dim] + list(num_hidden) + [lsd]
    weights, biases = [], []
    for i in range(len(dims) - 1):
        fan_in, fan_out = dims[i], dims[i + 1]
        key, wk, bk = jax.random.split(key, 3)
        bound = 1.0 / jnp.sqrt(float(fan_in))
        w = jax.random.uniform(wk, (fan_in, fan_out), dtype=dtype,
                               minval=-bound, maxval=bound)
        b = jax.random.uniform(bk, (1, fan_out), dtype=dtype,
                               minval=-bound, maxval=bound)
        weights.append(w)
        biases.append(b)
    return weights, biases


def _reference_forward(x, weights, biases, activation):
    """Pure-JAX reference (mirrors the torch nn.Sequential)."""
    act = {
        "ReLU": lambda h: jnp.maximum(h, 0.0),
        "Tanh": jnp.tanh,
        "ELU": lambda h: jnp.where(h > 0, h, jnp.expm1(h)),
    }[activation]
    h = x
    n = len(weights)
    for i in range(n):
        h = h @ weights[i] + biases[i]
        if i < n - 1:
            h = act(h)
    return h


# --------------------------------------------------------------------------- #
# Demo / correctness check
# --------------------------------------------------------------------------- #
if __name__ == "__main__":
    # Module config (consistent with TaskNetMu.__init__):
    #   ltd = 64 -> input dim = 32, num_hidden = (64, 32), lsd = 16.
    ltd, lsd = 64, 16
    num_hidden = (64, 32)
    batch = 20

    key = jax.random.PRNGKey(0)
    key, xk = jax.random.split(key)
    latent_task_mu = jax.random.normal(xk, (batch, ltd // 2), dtype=jnp.float32)

    weights, biases = init_task_net_mu_params(key, ltd, lsd, num_hidden,
                                              dtype=jnp.float32)

    # f32 MXU path (single grid step, blk == B): ReLU and ELU.
    for act_name in ("ReLU", "ELU"):
        prepared = prepare_task_net_mu_params(weights, biases, act_name)
        out = jax.block_until_ready(task_net_mu_forward(latent_task_mu, prepared))
        ref = _reference_forward(latent_task_mu, weights, biases, act_name)
        assert out.shape == (batch, lsd)
        assert jnp.allclose(out, ref, atol=1e-5, rtol=1e-5), f"{act_name} mismatch"

    # bf16 MXU operands (v6e/v7x fast path), f32 accumulation / VPU math.
    prepared_bf16 = prepare_task_net_mu_params(weights, biases, "ReLU",
                                               mxu_dtype=jnp.bfloat16)
    out_bf16 = jax.block_until_ready(task_net_mu_forward(latent_task_mu, prepared_bf16))
    ref = _reference_forward(latent_task_mu, weights, biases, "ReLU")
    assert jnp.allclose(out_bf16, ref, atol=5e-2, rtol=5e-2), "bf16 mismatch"

    # Larger ragged batch: exercises the multi-step 'parallel' grid + pad/slice path.
    key, xk2 = jax.random.split(key)
    x_big = jax.random.normal(xk2, (600, ltd // 2), dtype=jnp.float32)
    prepared = prepare_task_net_mu_params(weights, biases, "ReLU")
    out_big = jax.block_until_ready(task_net_mu_forward(x_big, prepared))
    ref_big = _reference_forward(x_big, weights, biases, "ReLU")
    assert out_big.shape == (600, lsd)
    assert jnp.allclose(out_big, ref_big, atol=1e-5, rtol=1e-5), "big-batch mismatch"

    print("KERNEL_OK")
</pallas_src>

<mosaic_0001>
module attributes {stable_mosaic.version = 11 : i64} {
  func.func @kernel(%arg0: i32, %arg1: memref<20x32xf32, #tpu.memory_space<vmem>>, %arg2: memref<32x128xf32, #tpu.memory_space<vmem>>, %arg3: memref<128x128xf32, #tpu.memory_space<vmem>>, %arg4: memref<128x16xf32, #tpu.memory_space<vmem>>, %arg5: memref<1x128xf32, #tpu.memory_space<vmem>>, %arg6: memref<1x128xf32, #tpu.memory_space<vmem>>, %arg7: memref<1x16xf32, #tpu.memory_space<vmem>>, %arg8: memref<20x16xf32, #tpu.memory_space<vmem>>) attributes {dimension_semantics = [#tpu.dimension_semantics<parallel>], iteration_bounds = array<i64: 1>, scalar_prefetch = 0 : i64, scratch_operands = 0 : i64, tpu.core_type = #tpu.core_type<tc>, window_params = [{transform_indices = @transform_0, window_bounds = array<i64: 20, 32>}, {pipeline_mode = #tpu.pipeline_mode<synchronous>, transform_indices = @transform_1, window_bounds = array<i64: 32, 128>}, {pipeline_mode = #tpu.pipeline_mode<synchronous>, transform_indices = @transform_2, window_bounds = array<i64: 128, 128>}, {pipeline_mode = #tpu.pipeline_mode<synchronous>, transform_indices = @transform_3, window_bounds = array<i64: 128, 16>}, {pipeline_mode = #tpu.pipeline_mode<synchronous>, transform_indices = @transform_4, window_bounds = array<i64: 1, 128>}, {pipeline_mode = #tpu.pipeline_mode<synchronous>, transform_indices = @transform_5, window_bounds = array<i64: 1, 128>}, {pipeline_mode = #tpu.pipeline_mode<synchronous>, transform_indices = @transform_6, window_bounds = array<i64: 1, 16>}, {transform_indices = @transform_7, window_bounds = array<i64: 20, 16>}]} {
    %c0 = arith.constant 0 : index
    %c0_0 = arith.constant 0 : index
    %0 = vector.load %arg1[%c0, %c0_0] : memref<20x32xf32, #tpu.memory_space<vmem>>, vector<20x32xf32>
    %c0_1 = arith.constant 0 : index
    %c0_2 = arith.constant 0 : index
    %1 = vector.load %arg2[%c0_1, %c0_2] : memref<32x128xf32, #tpu.memory_space<vmem>>, vector<32x128xf32>
    %cst = arith.constant dense<0.000000e+00> : vector<20x128xf32>
    %2 = tpu.matmul %0, %1, %cst {dimension_numbers = #tpu.dot_dimension_numbers<[1], [0], [0], [1], [0, 0, 1, 1], [], []>} : vector<20x32xf32>, vector<32x128xf32>, vector<20x128xf32> -> vector<20x128xf32>
    %c0_3 = arith.constant 0 : index
    %c0_4 = arith.constant 0 : index
    %3 = vector.load %arg5[%c0_3, %c0_4] : memref<1x128xf32, #tpu.memory_space<vmem>>, vector<1x128xf32>
    %4 = vector.broadcast %3 : vector<1x128xf32> to vector<20x128xf32>
    %5 = arith.addf %2, %4 : vector<20x128xf32>
    %cst_5 = arith.constant 0.000000e+00 : f32
    %6 = vector.broadcast %cst_5 : f32 to vector<20x128xf32>
    %7 = arith.maximumf %5, %6 : vector<20x128xf32>
    %c0_6 = arith.constant 0 : index
    %c0_7 = arith.constant 0 : index
    %8 = vector.load %arg3[%c0_6, %c0_7] : memref<128x128xf32, #tpu.memory_space<vmem>>, vector<128x128xf32>
    %cst_8 = arith.constant dense<0.000000e+00> : vector<20x128xf32>
    %9 = tpu.matmul %7, %8, %cst_8 {dimension_numbers = #tpu.dot_dimension_numbers<[1], [0], [0], [1], [0, 0, 1, 1], [], []>} : vector<20x128xf32>, vector<128x128xf32>, vector<20x128xf32> -> vector<20x128xf32>
    %c0_9 = arith.constant 0 : index
    %c0_10 = arith.constant 0 : index
    %10 = vector.load %arg6[%c0_9, %c0_10] : memref<1x128xf32, #tpu.memory_space<vmem>>, vector<1x128xf32>
    %11 = vector.broadcast %10 : vector<1x128xf32> to vector<20x128xf32>
    %12 = arith.addf %9, %11 : vector<20x128xf32>
    %cst_11 = arith.constant 0.000000e+00 : f32
    %13 = vector.broadcast %cst_11 : f32 to vector<20x128xf32>
    %14 = arith.maximumf %12, %13 : vector<20x128xf32>
    %c0_12 = arith.constant 0 : index
    %c0_13 = arith.constant 0 : index
    %15 = vector.load %arg4[%c0_12, %c0_13] : memref<128x16xf32, #tpu.memory_space<vmem>>, vector<128x16xf32>
    %cst_14 = arith.constant dense<0.000000e+00> : vector<20x16xf32>
    %16 = tpu.matmul %14, %15, %cst_14 {dimension_numbers = #tpu.dot_dimension_numbers<[1], [0], [0], [1], [0, 0, 1, 1], [], []>} : vector<20x128xf32>, vector<128x16xf32>, vector<20x16xf32> -> vector<20x16xf32>
    %c0_15 = arith.constant 0 : index
    %c0_16 = arith.constant 0 : index
    %17 = vector.load %arg7[%c0_15, %c0_16] : memref<1x16xf32, #tpu.memory_space<vmem>>, vector<1x16xf32>
    %18 = vector.broadcast %17 : vector<1x16xf32> to vector<20x16xf32>
    %19 = arith.addf %16, %18 : vector<20x16xf32>
    %c0_17 = arith.constant 0 : index
    %c0_18 = arith.constant 0 : index
    %20 = vector.load %arg8[%c0_17, %c0_18] : memref<20x16xf32, #tpu.memory_space<vmem>>, vector<20x16xf32>
    tpu.vector_store %arg8[%c0_17, %c0_18], %19 {strides = array<i32>} : memref<20x16xf32, #tpu.memory_space<vmem>>, vector<20x16xf32>,
    return
  }
  func.func @transform_0(%arg0: i32) -> (i32, i32) {
    %c0_i32 = arith.constant 0 : i32
    %c0_i32_0 = arith.constant 0 : i32
    return %arg0, %c0_i32 : i32, i32
  }
  func.func @transform_1(%arg0: i32) -> (i32, i32) {
    %c0_i32 = arith.constant 0 : i32
    %c0_i32_0 = arith.constant 0 : i32
    %c0_i32_1 = arith.constant 0 : i32
    return %c0_i32, %c0_i32_0 : i32, i32
  }
  func.func @transform_2(%arg0: i32) -> (i32, i32) {
    %c0_i32 = arith.constant 0 : i32
    %c0_i32_0 = arith.constant 0 : i32
    %c0_i32_1 = arith.constant 0 : i32
    return %c0_i32, %c0_i32_0 : i32, i32
  }
  func.func @transform_3(%arg0: i32) -> (i32, i32) {
    %c0_i32 = arith.constant 0 : i32
    %c0_i32_0 = arith.constant 0 : i32
    %c0_i32_1 = arith.constant 0 : i32
    return %c0_i32, %c0_i32_0 : i32, i32
  }
  func.func @transform_4(%arg0: i32) -> (i32, i32) {
    %c0_i32 = arith.constant 0 : i32
    %c0_i32_0 = arith.constant 0 : i32
    %c0_i32_1 = arith.constant 0 : i32
    return %c0_i32, %c0_i32_0 : i32, i32
  }
  func.func @transform_5(%arg0: i32) -> (i32, i32) {
    %c0_i32 = arith.constant 0 : i32
    %c0_i32_0 = arith.constant 0 : i32
    %c0_i32_1 = arith.constant 0 : i32
    return %c0_i32, %c0_i32_0 : i32, i32
  }
  func.func @transform_6(%arg0: i32) -> (i32, i32) {
    %c0_i32 = arith.constant 0 : i32
    %c0_i32_0 = arith.constant 0 : i32
    %c0_i32_1 = arith.constant 0 : i32
    return %c0_i32, %c0_i32_0 : i32, i32
  }
  func.func @transform_7(%arg0: i32) -> (i32, i32) {
    %c0_i32 = arith.constant 0 : i32
    %c0_i32_0 = arith.constant 0 : i32
    return %arg0, %c0_i32 : i32, i32
  }
}

module attributes {stable_mosaic.version = 11 : i64} {
  func.func @kernel(%arg0: i32, %arg1: memref<20x32xf32, #tpu.memory_space<vmem>>, %arg2: memref<32x128xf32, #tpu.memory_space<vmem>>, %arg3: memref<128x128xf32, #tpu.memory_space<vmem>>, %arg4: memref<128x16xf32, #tpu.memory_space<vmem>>, %arg5: memref<1x128xf32, #tpu.memory_space<vmem>>, %arg6: memref<1x128xf32, #tpu.memory_space<vmem>>, %arg7: memref<1x16xf32, #tpu.memory_space<vmem>>, %arg8: memref<20x16xf32, #tpu.memory_space<vmem>>) attributes {dimension_semantics = [#tpu.dimension_semantics<parallel>], iteration_bounds = array<i64: 1>, scalar_prefetch = 0 : i64, scratch_operands = 0 : i64, tpu.core_type = #tpu.core_type<tc>, window_params = [{transform_indices = @transform_0, window_bounds = array<i64: 20, 32>}, {pipeline_mode = #tpu.pipeline_mode<synchronous>, transform_indices = @transform_1, window_bounds = array<i64: 32, 128>}, {pipeline_mode = #tpu.pipeline_mode<synchronous>, transform_indices = @transform_2, window_bounds = array<i64: 128, 128>}, {pipeline_mode = #tpu.pipeline_mode<synchronous>, transform_indices = @transform_3, window_bounds = array<i64: 128, 16>}, {pipeline_mode = #tpu.pipeline_mode<synchronous>, transform_indices = @transform_4, window_bounds = array<i64: 1, 128>}, {pipeline_mode = #tpu.pipeline_mode<synchronous>, transform_indices = @transform_5, window_bounds = array<i64: 1, 128>}, {pipeline_mode = #tpu.pipeline_mode<synchronous>, transform_indices = @transform_6, window_bounds = array<i64: 1, 16>}, {transform_indices = @transform_7, window_bounds = array<i64: 20, 16>}]} {
    %c0 = arith.constant 0 : index
    %c0_0 = arith.constant 0 : index
    %0 = vector.load %arg1[%c0, %c0_0] : memref<20x32xf32, #tpu.memory_space<vmem>>, vector<20x32xf32>
    %c0_1 = arith.constant 0 : index
    %c0_2 = arith.constant 0 : index
    %1 = vector.load %arg2[%c0_1, %c0_2] : memref<32x128xf32, #tpu.memory_space<vmem>>, vector<32x128xf32>
    %cst = arith.constant dense<0.000000e+00> : vector<20x128xf32>
    %2 = tpu.matmul %0, %1, %cst {dimension_numbers = #tpu.dot_dimension_numbers<[1], [0], [0], [1], [0, 0, 1, 1], [], []>} : vector<20x32xf32>, vector<32x128xf32>, vector<20x128xf32> -> vector<20x128xf32>
    %c0_3 = arith.constant 0 : index
    %c0_4 = arith.constant 0 : index
    %3 = vector.load %arg5[%c0_3, %c0_4] : memref<1x128xf32, #tpu.memory_space<vmem>>, vector<1x128xf32>
    %4 = vector.broadcast %3 : vector<1x128xf32> to vector<20x128xf32>
    %5 = arith.addf %2, %4 : vector<20x128xf32>
    %cst_5 = arith.constant 0.000000e+00 : f32
    %6 = vector.broadcast %cst_5 : f32 to vector<20x128xf32>
    %7 = arith.maximumf %5, %6 : vector<20x128xf32>
    %c0_6 = arith.constant 0 : index
    %c0_7 = arith.constant 0 : index
    %8 = vector.load %arg3[%c0_6, %c0_7] : memref<128x128xf32, #tpu.memory_space<vmem>>, vector<128x128xf32>
    %cst_8 = arith.constant dense<0.000000e+00> : vector<20x128xf32>
    %9 = tpu.matmul %7, %8, %cst_8 {dimension_numbers = #tpu.dot_dimension_numbers<[1], [0], [0], [1], [0, 0, 1, 1], [], []>} : vector<20x128xf32>, vector<128x128xf32>, vector<20x128xf32> -> vector<20x128xf32>
    %c0_9 = arith.constant 0 : index
    %c0_10 = arith.constant 0 : index
    %10 = vector.load %arg6[%c0_9, %c0_10] : memref<1x128xf32, #tpu.memory_space<vmem>>, vector<1x128xf32>
    %11 = vector.broadcast %10 : vector<1x128xf32> to vector<20x128xf32>
    %12 = arith.addf %9, %11 : vector<20x128xf32>
    %cst_11 = arith.constant 0.000000e+00 : f32
    %13 = vector.broadcast %cst_11 : f32 to vector<20x128xf32>
    %14 = arith.maximumf %12, %13 : vector<20x128xf32>
    %c0_12 = arith.constant 0 : index
    %c0_13 = arith.constant 0 : index
    %15 = vector.load %arg4[%c0_12, %c0_13] : memref<128x16xf32, #tpu.memory_space<vmem>>, vector<128x16xf32>
    %cst_14 = arith.constant dense<0.000000e+00> : vector<20x16xf32>
    %16 = tpu.matmul %14, %15, %cst_14 {dimension_numbers = #tpu.dot_dimension_numbers<[1], [0], [0], [1], [0, 0, 1, 1], [], []>} : vector<20x128xf32>, vector<128x16xf32>, vector<20x16xf32> -> vector<20x16xf32>
    %c0_15 = arith.constant 0 : index
    %c0_16 = arith.constant 0 : index
    %17 = vector.load %arg7[%c0_15, %c0_16] : memref<1x16xf32, #tpu.memory_space<vmem>>, vector<1x16xf32>
    %18 = vector.broadcast %17 : vector<1x16xf32> to vector<20x16xf32>
    %19 = arith.addf %16, %18 : vector<20x16xf32>
    %c0_17 = arith.constant 0 : index
    %c0_18 = arith.constant 0 : index
    %20 = vector.load %arg8[%c0_17, %c0_18] : memref<20x16xf32, #tpu.memory_space<vmem>>, vector<20x16xf32>
    tpu.vector_store %arg8[%c0_17, %c0_18], %19 {strides = array<i32>} : memref<20x16xf32, #tpu.memory_space<vmem>>, vector<20x16xf32>,
    return
  }
  func.func @transform_0(%arg0: i32) -> (i32, i32) {
    %c0_i32 = arith.constant 0 : i32
    %c0_i32_0 = arith.constant 0 : i32
    return %arg0, %c0_i32 : i32, i32
  }
  func.func @transform_1(%arg0: i32) -> (i32, i32) {
    %c0_i32 = arith.constant 0 : i32
    %c0_i32_0 = arith.constant 0 : i32
    %c0_i32_1 = arith.constant 0 : i32
    return %c0_i32, %c0_i32_0 : i32, i32
  }
  func.func @transform_2(%arg0: i32) -> (i32, i32) {
    %c0_i32 = arith.constant 0 : i32
    %c0_i32_0 = arith.constant 0 : i32
    %c0_i32_1 = arith.constant 0 : i32
    return %c0_i32, %c0_i32_0 : i32, i32
  }
  func.func @transform_3(%arg0: i32) -> (i32, i32) {
    %c0_i32 = arith.constant 0 : i32
    %c0_i32_0 = arith.constant 0 : i32
    %c0_i32_1 = arith.constant 0 : i32
    return %c0_i32, %c0_i32_0 : i32, i32
  }
  func.func @transform_4(%arg0: i32) -> (i32, i32) {
    %c0_i32 = arith.constant 0 : i32
    %c0_i32_0 = arith.constant 0 : i32
    %c0_i32_1 = arith.constant 0 : i32
    return %c0_i32, %c0_i32_0 : i32, i32
  }
  func.func @transform_5(%arg0: i32) -> (i32, i32) {
    %c0_i32 = arith.constant 0 : i32
    %c0_i32_0 = arith.constant 0 : i32
    %c0_i32_1 = arith.constant 0 : i32
    return %c0_i32, %c0_i32_0 : i32, i32
  }
  func.func @transform_6(%arg0: i32) -> (i32, i32) {
    %c0_i32 = arith.constant 0 : i32
    %c0_i32_0 = arith.constant 0 : i32
    %c0_i32_1 = arith.constant 0 : i32
    return %c0_i32, %c0_i32_0 : i32, i32
  }
  func.func @transform_7(%arg0: i32) -> (i32, i32) {
    %c0_i32 = arith.constant 0 : i32
    %c0_i32_0 = arith.constant 0 : i32
    return %arg0, %c0_i32 : i32, i32
  }
}

</mosaic_0001>

<bundles_post_ra>
// kernel: tpu_custom_call.1
= control target key start
LH: loop header
LB: loop body
LE: loop exit
PB: predicated region body
PF: predicated region fallthrough
CT: control target
= control target key end

     0   :  { %12 = vsyncpa [#allocation3], 0  ;;  %s475_s0 = inlined_call_operand.hbm [shape: f32[20,32], index: 0, kind: input, shape index: {}]   ;;  %s476_s1 = inlined_call_operand.hbm [shape: f32[32,128], index: 1, kind: input, shape index: {}]   ;;  %s477_s2 = inlined_call_operand.vmem [shape: f32[128,128], index: 2, kind: input, shape index: {}]   ;;  %s478_s3 = inlined_call_operand.vmem [shape: f32[128,16], index: 3, kind: input, shape index: {}]   ;;  %s479_s4 = inlined_call_operand.vmem [shape: f32[1,128], index: 4, kind: input, shape index: {}]   ;;  %s480_s5 = inlined_call_operand.vmem [shape: f32[1,128], index: 5, kind: input, shape index: {}]   ;;  %s481_s6 = inlined_call_operand.vmem [shape: f32[1,16], index: 6, kind: input, shape index: {}]   ;;  %s482_s7 = inlined_call_operand.vmem [shape: f32[20,16], index: 7, kind: output, shape index: {}]  }
   0x1   :  { %s18_s26 = sshll.u32 %s475_s0, 4  ;;  %s19_s26 = int_to_ptr.hbm [resolvable:$true] %s18_s26 }
   0x2   :  { %13 = vsyncpa [#allocation5], 0  ;;  %s308_s27 = smov [#allocation2]   ;;  %s31_s8 = sshll.u32 %s476_s1, 4  ;;  %s32_s8 = int_to_ptr.hbm [resolvable:$true] %s31_s8 }
   0x3   :  { %s20_s28 = sshll.u32 %s308_s27, 4  ;;  %s309_s9 = smov 128   ;;  %s21_s28 = int_to_ptr.vmem [resolvable:$true] %s20_s28 }
   0x4   :  { %s310_s10 = smov 8   ;;  %s311_s11 = smov [#allocation4]  }
   0x5   :  { %26 = dma.hbm_to_vmem [thread:$0]  %s19_s26, 384, %s21_s28, [#allocation3], %s309_s9, %s309_s9, %s310_s10  }
   0x6   :  { %s33_s12 = sshll.u32 %s311_s11, 4  ;;  %s34_s12 = int_to_ptr.vmem [resolvable:$true] %s33_s12 }
   0x7   :  { %39 = dma.hbm_to_vmem [thread:$0]  %s32_s8, 512, %s34_s12, [#allocation5], %s309_s9, %s309_s9, %s310_s10  }
   0x8   :  { %304 = dma.done.wait [#allocation3], 384  }
   0x9   :  { %305 = vsyncadd [#allocation3], 4294966912 }
   0xa   :  { %306 = dma.done.wait [#allocation5], 512  }
   0xb   :  { %307 = vsyncadd [#allocation5], 4294966784  ;;  %v64_v0 = vld [vmem:[#allocation4 + $0x18] sm:$0xff]  ;;  %v63_v1 = vld [vmem:[#allocation4 + $0x10] sm:$0xff]  ;;  %vm69_vm0 = vcmask 261120   ;;  %vm203_vm1 = vcmask 130048  }
   0xc   :  { %91 = vmatpush.msra.mxu0 %v64_v0  ;;  %v62_v2 = vld [vmem:[#allocation4 + $0x8] sm:$0xff]  ;;  %v123_v3 = vld [vmem:[%s477_s2 + $0x78] sm:$0xff]  ;;  %v122_v4 = vld [vmem:[%s477_s2 + $0x70] sm:$0xff]  ;;  %vm206_vm2 = vcmask 125952  }
   0xd   :  { %128 = vmatpush.msra.mxu1 %v123_v3  ;;  %v61_v5 = vld [vmem:[#allocation4] sm:$0xff]  ;;  %v121_v6 = vld [vmem:[%s477_s2 + $0x68] sm:$0xff]  ;;  %217 = vmatpush.msra.mxu3 %v123_v3  ;;  %v58_v7 = vld [vmem:[#allocation2] sm:$0xff] }
   0xe   :  { %92 = vmatpush.msra.mxu0 %v63_v1  ;;  %v120_v8 = vld [vmem:[%s477_s2 + $0x60] sm:$0xff]  ;;  %v119_v9 = vld [vmem:[%s477_s2 + $0x58] sm:$0xff]  ;;  %v118_v10 = vld [vmem:[%s477_s2 + $0x50] sm:$0xff] }
   0xf   :  { %129 = vmatpush.msra.mxu1 %v122_v4  ;;  %218 = vmatpush.msra.mxu3 %v122_v4  ;;  %v117_v11 = vld [vmem:[%s477_s2 + $0x48] sm:$0xff]  ;;  %v116_v13 = vld [vmem:[%s477_s2 + $0x40] sm:$0xff]  ;;  %v115_v14 = vld [vmem:[%s477_s2 + $0x38] sm:$0xff] }
  0x10   :  { %93 = vmatpush.msra.mxu0 %v62_v2  ;;  %v59_v12 = vld [vmem:[#allocation2 + $0x8] sm:$0xff]  ;;  %v114_v15 = vld [vmem:[%s477_s2 + $0x30] sm:$0xff]  ;;  %v112_v18 = vld [vmem:[%s477_s2 + $0x20] sm:$0xff] }
  0x11   :  { %130 = vmatpush.msra.mxu1 %v121_v6  ;;  %219 = vmatpush.msra.mxu3 %v121_v6  ;;  %v113_v16 = vld [vmem:[%s477_s2 + $0x28] sm:$0xff]  ;;  %v60_v17 = vld [vmem:[#allocation2 + $0x10] sm:$0xf]  ;;  %v111_v19 = vld [vmem:[%s477_s2 + $0x18] sm:$0xff] }
  0x12   :  { %94 = vmatpush.msra.mxu0 %v61_v5  ;;  %v110_v20 = vld [vmem:[%s477_s2 + $0x10] sm:$0xff]  ;;  %v109_v21 = vld [vmem:[%s477_s2 + $0x8] sm:$0xff]  ;;  %v108_v22 = vld [vmem:[%s477_s2] sm:$0xff] }
  0x13   :  { %214 = vmatmul.msk.f32.vlgmr.msra.gmra.mxu0 %vm69_vm0, %v58_v7  ;;  %131 = vmatpush.msra.mxu1 %v120_v8  ;;  %v172_v23 = vld [vmem:[%s478_s3 + $0x78] sm:$0xff]  ;;  %v171_v24 = vld [vmem:[%s478_s3 + $0x70] sm:$0xff]  ;;  %v170_v25 = vld [vmem:[%s478_s3 + $0x68] sm:$0xff] }
  0x14   :  { %220 = vmatpush.msra.mxu3 %v120_v8  ;;  %177 = vmatpush.msrb.mxu0 %v172_v23  ;;  %v169_v26 = vld [vmem:[%s478_s3 + $0x60] sm:$0xff]  ;;  %v168_v27 = vld [vmem:[%s478_s3 + $0x58] sm:$0xff]  ;;  %v167_v29 = vld [vmem:[%s478_s3 + $0x50] sm:$0xff] }
  0x15   :  { %132 = vmatpush.msra.mxu1 %v119_v9  ;;  %233 = vmatpush.msra.mxu2 %v172_v23  ;;  %v253_v28 = vld [vmem:[%s479_s4] ss:$0 sm:$0xff]  ;;  %v166_v30 = vld [vmem:[%s478_s3 + $0x48] sm:$0xff]  ;;  %v164_v35 = vld [vmem:[%s478_s3 + $0x38] sm:$0xff] }
  0x16   :  { %221 = vmatpush.msra.mxu3 %v119_v9  ;;  %178 = vmatpush.msrb.mxu0 %v171_v24  ;;  %v165_v33 = vld [vmem:[%s478_s3 + $0x40] sm:$0xff]  ;;  %v163_v36 = vld [vmem:[%s478_s3 + $0x30] sm:$0xff]  ;;  %v162_v37 = vld [vmem:[%s478_s3 + $0x28] sm:$0xff] }
  0x17   :  { %133 = vmatpush.msra.mxu1 %v118_v10  ;;  %234 = vmatpush.msra.mxu2 %v171_v24  ;;  %v161_v40 = vld [vmem:[%s478_s3 + $0x20] sm:$0xff]  ;;  %v160_v42 = vld [vmem:[%s478_s3 + $0x18] sm:$0xff]  ;;  %v159_v46 = vld [vmem:[%s478_s3 + $0x10] sm:$0xff] }
  0x18   :  { %222 = vmatpush.msra.mxu3 %v118_v10  ;;  %179 = vmatpush.msrb.mxu0 %v170_v25  ;;  %v158_v47 = vld [vmem:[%s478_s3 + $0x8] sm:$0xff]  ;;  %v157_v48 = vld [vmem:[%s478_s3] sm:$0xff] }
  0x19   :  { %134 = vmatpush.msra.mxu1 %v117_v11  ;;  %235 = vmatpush.msra.mxu2 %v170_v25  ;;  %v254_v49 = vld [vmem:[%s480_s5] ss:$0 sm:$0xff] }
  0x1a   :  { %223 = vmatpush.msra.mxu3 %v117_v11  ;;  %180 = vmatpush.msrb.mxu0 %v169_v26  ;;  %v255_v59 = vld [vmem:[%s481_s6] ss:$0 sm:$0xff] }
  0x1b   :  { %215 = vmatmul.msk.f32.gmra.mxu0 %vm69_vm0, %v59_v12  ;;  %135 = vmatpush.msra.mxu1 %v116_v13 }
  0x1c   :  { %224 = vmatpush.msra.mxu3 %v116_v13  ;;  %236 = vmatpush.msra.mxu2 %v169_v26 }
  0x1d   :  { %136 = vmatpush.msra.mxu1 %v115_v14  ;;  %181 = vmatpush.msrb.mxu0 %v168_v27 }
  0x1e   :  { %225 = vmatpush.msra.mxu3 %v115_v14  ;;  %237 = vmatpush.msra.mxu2 %v168_v27 }
  0x1f   :  { %137 = vmatpush.msra.mxu1 %v114_v15  ;;  %182 = vmatpush.msrb.mxu0 %v167_v29 }
  0x20   :  { %226 = vmatpush.msra.mxu3 %v114_v15  ;;  %238 = vmatpush.msra.mxu2 %v167_v29 }
  0x21   :  { %138 = vmatpush.msra.mxu1 %v113_v16  ;;  %183 = vmatpush.msrb.mxu0 %v166_v30 }
  0x22   :  { %227 = vmatpush.msra.mxu3 %v113_v16  ;;  %239 = vmatpush.msra.mxu2 %v166_v30 }
  0x23   :  { %216 = vmatmul.msk.f32.gmra.mxu0 %vm69_vm0, %v60_v17  ;;  %139 = vmatpush.msra.mxu1 %v112_v18 }
  0x24   :  { %228 = vmatpush.msra.mxu3 %v112_v18  ;;  %184 = vmatpush.msrb.mxu0 %v165_v33 }
  0x25   :  { %140 = vmatpush.msra.mxu1 %v111_v19  ;;  %240 = vmatpush.msra.mxu2 %v165_v33 }
  0x26   :  { %229 = vmatpush.msra.mxu3 %v111_v19  ;;  %185 = vmatpush.msrb.mxu0 %v164_v35 }
  0x27   :  { %141 = vmatpush.msra.mxu1 %v110_v20  ;;  %241 = vmatpush.msra.mxu2 %v164_v35 }
  0x28   :  { %230 = vmatpush.msra.mxu3 %v110_v20  ;;  %186 = vmatpush.msrb.mxu0 %v163_v36 }
  0x29   :  { %142 = vmatpush.msra.mxu1 %v109_v21  ;;  %242 = vmatpush.msra.mxu2 %v163_v36 }
  0x2a   :  { %231 = vmatpush.msra.mxu3 %v109_v21  ;;  %187 = vmatpush.msrb.mxu0 %v162_v37 }
  0x2b   :  { %143 = vmatpush.msra.mxu1 %v108_v22  ;;  %243 = vmatpush.msra.mxu2 %v162_v37 }
  0x2c   :  { %232 = vmatpush.msra.mxu3 %v108_v22  ;;  %188 = vmatpush.msrb.mxu0 %v161_v40 }
  0x2d   :  { %244 = vmatpush.msra.mxu2 %v161_v40 }
  0x2e   :  { %189 = vmatpush.msrb.mxu0 %v160_v42 }
  0x2f   :  { %245 = vmatpush.msra.mxu2 %v160_v42 }
  0x30   :  { %190 = vmatpush.msrb.mxu0 %v159_v46 }
  0x31   :  { %246 = vmatpush.msra.mxu2 %v159_v46 }
  0x32   :  { %191 = vmatpush.msrb.mxu0 %v158_v47 }
  0x33   :  { %247 = vmatpush.msra.mxu2 %v158_v47 }
  0x34   :  { %192 = vmatpush.msrb.mxu0 %v157_v48 }
  0x35   :  { %248 = vmatpush.msra.mxu2 %v157_v48 }
  0x90   :  { %v96_v31 = vpop.f32.mrf.mxu0 }
  0x91   :  { %v97_v32 = vadd.f32 %v253_v28, %v96_v31 }
  0x93   :  { %v105_v34 = vmax.f32 %v97_v32, 0.0 }
  0x95   :  { %144 = vmatmul.f32.vlgmr.msra.gmra.mxu1 %v105_v34 }
  0x98   :  { %v99_v38 = vpop.f32.mrf.mxu0 }
  0x99   :  { %v100_v39 = vadd.f32 %v253_v28, %v99_v38 }
  0x9b   :  { %v106_v41 = vmax.f32 %v100_v39, 0.0 }
  0x9d   :  { %147 = vmatmul.f32.vlgmr.msra.gmra.mxu3 %v106_v41 }
  0xa0   :  { %v102_v43 = vpop.f32.mrf.mxu0 }
  0xa1   :  { %v103_v44 = vadd.f32 %v253_v28, %v102_v43 }
  0xa3   :  { %v107_v45 = vmax.f32 %v103_v44, 0.0 }
  0xa5   :  { %150 = vmatmul.f32.gmra.mxu3 %v107_v45 }
 0x112   :  { %v145_v50 = vpop.f32.mrf.mxu1 }
 0x113   :  { %v146_v51 = vadd.f32 %v254_v49, %v145_v50 }
 0x115   :  { %v154_v52 = vmax.f32 %v146_v51, 0.0 }
 0x117   :  { %193 = vmatmul.f32.vlgmr.msrb.gmra.mxu0 %v154_v52 }
 0x120   :  { %v148_v53 = vpop.f32.mrf.mxu3 }
 0x121   :  { %v149_v54 = vadd.f32 %v254_v49, %v148_v53 }
 0x123   :  { %v155_v55 = vmax.f32 %v149_v54, 0.0 }
 0x125   :  { %196 = vmatmul.f32.vlgmr.msra.gmra.mxu2 %v155_v55 }
 0x128   :  { %v151_v56 = vpop.f32.mrf.mxu3 }
 0x129   :  { %v152_v57 = vadd.f32 %v254_v49, %v151_v56 }
 0x12b   :  { %v156_v58 = vmax.f32 %v152_v57, 0.0 }
 0x12d   :  { %199 = vmatmul.f32.gmra.mxu2 %v156_v58 }
 0x194   :  { %v194_v60 = vpop.f32.mrf.mxu0 }
 0x195   :  { %v195_v61 = vadd.f32 %v255_v59, %v194_v60 }
 0x197   :  { %204 = vst.msk [vmem:[%s482_s7] sm:$0xff] %vm203_vm1, %v195_v61 }
 0x1a8   :  { %v197_v62 = vpop.f32.mrf.mxu2 }
 0x1a9   :  { %v198_v63 = vadd.f32 %v255_v59, %v197_v62 }
 0x1ab   :  { %205 = vst.msk [vmem:[%s482_s7 + $0x8] sm:$0xff] %vm203_vm1, %v198_v63 }
 0x1b0   :  { %v200_v0 = vpop.f32.mrf.mxu2 }
 0x1b1   :  { %v201_v1 = vadd.f32 %v255_v59, %v200_v0 }
 0x1b3   :  { %207 = vst.msk [vmem:[%s482_s7 + $0x10] sm:$0xf] %vm206_vm2, %v201_v1 }
 0x1b4   :  { %212 = vsyncpa [#allocation3], 1 }
 0x1b5   :  { %213 = vsyncpa [#allocation5], 1 }

// kernel: tpu_custom_call.1
= control target key start
LH: loop header
LB: loop body
LE: loop exit
PB: predicated region body
PF: predicated region fallthrough
CT: control target
= control target key end

     0   :  { %12 = vsyncpa [#allocation3], 0  ;;  %s475_s0 = inlined_call_operand.hbm [shape: f32[20,32], index: 0, kind: input, shape index: {}]   ;;  %s476_s1 = inlined_call_operand.hbm [shape: f32[32,128], index: 1, kind: input, shape index: {}]   ;;  %s477_s2 = inlined_call_operand.vmem [shape: f32[128,128], index: 2, kind: input, shape index: {}]   ;;  %s478_s3 = inlined_call_operand.vmem [shape: f32[128,16], index: 3, kind: input, shape index: {}]   ;;  %s479_s4 = inlined_call_operand.vmem [shape: f32[1,128], index: 4, kind: input, shape index: {}]   ;;  %s480_s5 = inlined_call_operand.vmem [shape: f32[1,128], index: 5, kind: input, shape index: {}]   ;;  %s481_s6 = inlined_call_operand.vmem [shape: f32[1,16], index: 6, kind: input, shape index: {}]   ;;  %s482_s7 = inlined_call_operand.vmem [shape: f32[20,16], index: 7, kind: output, shape index: {}]  }
   0x1   :  { %s18_s26 = sshll.u32 %s475_s0, 4  ;;  %s19_s26 = int_to_ptr.hbm [resolvable:$true] %s18_s26 }
   0x2   :  { %13 = vsyncpa [#allocation5], 0  ;;  %s308_s27 = smov [#allocation2]   ;;  %s31_s8 = sshll.u32 %s476_s1, 4  ;;  %s32_s8 = int_to_ptr.hbm [resolvable:$true] %s31_s8 }
   0x3   :  { %s20_s28 = sshll.u32 %s308_s27, 4  ;;  %s309_s9 = smov 128   ;;  %s21_s28 = int_to_ptr.vmem [resolvable:$true] %s20_s28 }
   0x4   :  { %s310_s10 = smov 8   ;;  %s311_s11 = smov [#allocation4]  }
   0x5   :  { %26 = dma.hbm_to_vmem [thread:$0]  %s19_s26, 384, %s21_s28, [#allocation3], %s309_s9, %s309_s9, %s310_s10  }
   0x6   :  { %s33_s12 = sshll.u32 %s311_s11, 4  ;;  %s34_s12 = int_to_ptr.vmem [resolvable:$true] %s33_s12 }
   0x7   :  { %39 = dma.hbm_to_vmem [thread:$0]  %s32_s8, 512, %s34_s12, [#allocation5], %s309_s9, %s309_s9, %s310_s10  }
   0x8   :  { %304 = dma.done.wait [#allocation3], 384  }
   0x9   :  { %305 = vsyncadd [#allocation3], 4294966912 }
   0xa   :  { %306 = dma.done.wait [#allocation5], 512  }
   0xb   :  { %307 = vsyncadd [#allocation5], 4294966784  ;;  %v64_v0 = vld [vmem:[#allocation4 + $0x18] sm:$0xff]  ;;  %v63_v1 = vld [vmem:[#allocation4 + $0x10] sm:$0xff]  ;;  %vm69_vm0 = vcmask 261120   ;;  %vm203_vm1 = vcmask 130048  }
   0xc   :  { %91 = vmatpush.msra.mxu0 %v64_v0  ;;  %v62_v2 = vld [vmem:[#allocation4 + $0x8] sm:$0xff]  ;;  %v123_v3 = vld [vmem:[%s477_s2 + $0x78] sm:$0xff]  ;;  %v122_v4 = vld [vmem:[%s477_s2 + $0x70] sm:$0xff]  ;;  %vm206_vm2 = vcmask 125952  }
   0xd   :  { %128 = vmatpush.msra.mxu1 %v123_v3  ;;  %v61_v5 = vld [vmem:[#allocation4] sm:$0xff]  ;;  %v121_v6 = vld [vmem:[%s477_s2 + $0x68] sm:$0xff]  ;;  %217 = vmatpush.msra.mxu3 %v123_v3  ;;  %v58_v7 = vld [vmem:[#allocation2] sm:$0xff] }
   0xe   :  { %92 = vmatpush.msra.mxu0 %v63_v1  ;;  %v120_v8 = vld [vmem:[%s477_s2 + $0x60] sm:$0xff]  ;;  %v119_v9 = vld [vmem:[%s477_s2 + $0x58] sm:$0xff]  ;;  %v118_v10 = vld [vmem:[%s477_s2 + $0x50] sm:$0xff] }
   0xf   :  { %129 = vmatpush.msra.mxu1 %v122_v4  ;;  %218 = vmatpush.msra.mxu3 %v122_v4  ;;  %v117_v11 = vld [vmem:[%s477_s2 + $0x48] sm:$0xff]  ;;  %v116_v13 = vld [vmem:[%s477_s2 + $0x40] sm:$0xff]  ;;  %v115_v14 = vld [vmem:[%s477_s2 + $0x38] sm:$0xff] }
  0x10   :  { %93 = vmatpush.msra.mxu0 %v62_v2  ;;  %v59_v12 = vld [vmem:[#allocation2 + $0x8] sm:$0xff]  ;;  %v114_v15 = vld [vmem:[%s477_s2 + $0x30] sm:$0xff]  ;;  %v112_v18 = vld [vmem:[%s477_s2 + $0x20] sm:$0xff] }
  0x11   :  { %130 = vmatpush.msra.mxu1 %v121_v6  ;;  %219 = vmatpush.msra.mxu3 %v121_v6  ;;  %v113_v16 = vld [vmem:[%s477_s2 + $0x28] sm:$0xff]  ;;  %v60_v17 = vld [vmem:[#allocation2 + $0x10] sm:$0xf]  ;;  %v111_v19 = vld [vmem:[%s477_s2 + $0x18] sm:$0xff] }
  0x12   :  { %94 = vmatpush.msra.mxu0 %v61_v5  ;;  %v110_v20 = vld [vmem:[%s477_s2 + $0x10] sm:$0xff]  ;;  %v109_v21 = vld [vmem:[%s477_s2 + $0x8] sm:$0xff]  ;;  %v108_v22 = vld [vmem:[%s477_s2] sm:$0xff] }
  0x13   :  { %214 = vmatmul.msk.f32.vlgmr.msra.gmra.mxu0 %vm69_vm0, %v58_v7  ;;  %131 = vmatpush.msra.mxu1 %v120_v8  ;;  %v172_v23 = vld [vmem:[%s478_s3 + $0x78] sm:$0xff]  ;;  %v171_v24 = vld [vmem:[%s478_s3 + $0x70] sm:$0xff]  ;;  %v170_v25 = vld [vmem:[%s478_s3 + $0x68] sm:$0xff] }
  0x14   :  { %220 = vmatpush.msra.mxu3 %v120_v8  ;;  %177 = vmatpush.msrb.mxu0 %v172_v23  ;;  %v169_v26 = vld [vmem:[%s478_s3 + $0x60] sm:$0xff]  ;;  %v168_v27 = vld [vmem:[%s478_s3 + $0x58] sm:$0xff]  ;;  %v167_v29 = vld [vmem:[%s478_s3 + $0x50] sm:$0xff] }
  0x15   :  { %132 = vmatpush.msra.mxu1 %v119_v9  ;;  %233 = vmatpush.msra.mxu2 %v172_v23  ;;  %v253_v28 = vld [vmem:[%s479_s4] ss:$0 sm:$0xff]  ;;  %v166_v30 = vld [vmem:[%s478_s3 + $0x48] sm:$0xff]  ;;  %v164_v35 = vld [vmem:[%s478_s3 + $0x38] sm:$0xff] }
  0x16   :  { %221 = vmatpush.msra.mxu3 %v119_v9  ;;  %178 = vmatpush.msrb.mxu0 %v171_v24  ;;  %v165_v33 = vld [vmem:[%s478_s3 + $0x40] sm:$0xff]  ;;  %v163_v36 = vld [vmem:[%s478_s3 + $0x30] sm:$0xff]  ;;  %v162_v37 = vld [vmem:[%s478_s3 + $0x28] sm:$0xff] }
  0x17   :  { %133 = vmatpush.msra.mxu1 %v118_v10  ;;  %234 = vmatpush.msra.mxu2 %v171_v24  ;;  %v161_v40 = vld [vmem:[%s478_s3 + $0x20] sm:$0xff]  ;;  %v160_v42 = vld [vmem:[%s478_s3 + $0x18] sm:$0xff]  ;;  %v159_v46 = vld [vmem:[%s478_s3 + $0x10] sm:$0xff] }
  0x18   :  { %222 = vmatpush.msra.mxu3 %v118_v10  ;;  %179 = vmatpush.msrb.mxu0 %v170_v25  ;;  %v158_v47 = vld [vmem:[%s478_s3 + $0x8] sm:$0xff]  ;;  %v157_v48 = vld [vmem:[%s478_s3] sm:$0xff] }
  0x19   :  { %134 = vmatpush.msra.mxu1 %v117_v11  ;;  %235 = vmatpush.msra.mxu2 %v170_v25  ;;  %v254_v49 = vld [vmem:[%s480_s5] ss:$0 sm:$0xff] }
  0x1a   :  { %223 = vmatpush.msra.mxu3 %v117_v11  ;;  %180 = vmatpush.msrb.mxu0 %v169_v26  ;;  %v255_v59 = vld [vmem:[%s481_s6] ss:$0 sm:$0xff] }
  0x1b   :  { %215 = vmatmul.msk.f32.gmra.mxu0 %vm69_vm0, %v59_v12  ;;  %135 = vmatpush.msra.mxu1 %v116_v13 }
  0x1c   :  { %224 = vmatpush.msra.mxu3 %v116_v13  ;;  %236 = vmatpush.msra.mxu2 %v169_v26 }
  0x1d   :  { %136 = vmatpush.msra.mxu1 %v115_v14  ;;  %181 = vmatpush.msrb.mxu0 %v168_v27 }
  0x1e   :  { %225 = vmatpush.msra.mxu3 %v115_v14  ;;  %237 = vmatpush.msra.mxu2 %v168_v27 }
  0x1f   :  { %137 = vmatpush.msra.mxu1 %v114_v15  ;;  %182 = vmatpush.msrb.mxu0 %v167_v29 }
  0x20   :  { %226 = vmatpush.msra.mxu3 %v114_v15  ;;  %238 = vmatpush.msra.mxu2 %v167_v29 }
  0x21   :  { %138 = vmatpush.msra.mxu1 %v113_v16  ;;  %183 = vmatpush.msrb.mxu0 %v166_v30 }
  0x22   :  { %227 = vmatpush.msra.mxu3 %v113_v16  ;;  %239 = vmatpush.msra.mxu2 %v166_v30 }
  0x23   :  { %216 = vmatmul.msk.f32.gmra.mxu0 %vm69_vm0, %v60_v17  ;;  %139 = vmatpush.msra.mxu1 %v112_v18 }
  0x24   :  { %228 = vmatpush.msra.mxu3 %v112_v18  ;;  %184 = vmatpush.msrb.mxu0 %v165_v33 }
  0x25   :  { %140 = vmatpush.msra.mxu1 %v111_v19  ;;  %240 = vmatpush.msra.mxu2 %v165_v33 }
  0x26   :  { %229 = vmatpush.msra.mxu3 %v111_v19  ;;  %185 = vmatpush.msrb.mxu0 %v164_v35 }
  0x27   :  { %141 = vmatpush.msra.mxu1 %v110_v20  ;;  %241 = vmatpush.msra.mxu2 %v164_v35 }
  0x28   :  { %230 = vmatpush.msra.mxu3 %v110_v20  ;;  %186 = vmatpush.msrb.mxu0 %v163_v36 }
  0x29   :  { %142 = vmatpush.msra.mxu1 %v109_v21  ;;  %242 = vmatpush.msra.mxu2 %v163_v36 }
  0x2a   :  { %231 = vmatpush.msra.mxu3 %v109_v21  ;;  %187 = vmatpush.msrb.mxu0 %v162_v37 }
  0x2b   :  { %143 = vmatpush.msra.mxu1 %v108_v22  ;;  %243 = vmatpush.msra.mxu2 %v162_v37 }
  0x2c   :  { %232 = vmatpush.msra.mxu3 %v108_v22  ;;  %188 = vmatpush.msrb.mxu0 %v161_v40 }
  0x2d   :  { %244 = vmatpush.msra.mxu2 %v161_v40 }
  0x2e   :  { %189 = vmatpush.msrb.mxu0 %v160_v42 }
  0x2f   :  { %245 = vmatpush.msra.mxu2 %v160_v42 }
  0x30   :  { %190 = vmatpush.msrb.mxu0 %v159_v46 }
  0x31   :  { %246 = vmatpush.msra.mxu2 %v159_v46 }
  0x32   :  { %191 = vmatpush.msrb.mxu0 %v158_v47 }
  0x33   :  { %247 = vmatpush.msra.mxu2 %v158_v47 }
  0x34   :  { %192 = vmatpush.msrb.mxu0 %v157_v48 }
  0x35   :  { %248 = vmatpush.msra.mxu2 %v157_v48 }
  0x90   :  { %v96_v31 = vpop.f32.mrf.mxu0 }
  0x91   :  { %v97_v32 = vadd.f32 %v253_v28, %v96_v31 }
  0x93   :  { %v105_v34 = vmax.f32 %v97_v32, 0.0 }
  0x95   :  { %144 = vmatmul.f32.vlgmr.msra.gmra.mxu1 %v105_v34 }
  0x98   :  { %v99_v38 = vpop.f32.mrf.mxu0 }
  0x99   :  { %v100_v39 = vadd.f32 %v253_v28, %v99_v38 }
  0x9b   :  { %v106_v41 = vmax.f32 %v100_v39, 0.0 }
  0x9d   :  { %147 = vmatmul.f32.vlgmr.msra.gmra.mxu3 %v106_v41 }
  0xa0   :  { %v102_v43 = vpop.f32.mrf.mxu0 }
  0xa1   :  { %v103_v44 = vadd.f32 %v253_v28, %v102_v43 }
  0xa3   :  { %v107_v45 = vmax.f32 %v103_v44, 0.0 }
  0xa5   :  { %150 = vmatmul.f32.gmra.mxu3 %v107_v45 }
 0x112   :  { %v145_v50 = vpop.f32.mrf.mxu1 }
 0x113   :  { %v146_v51 = vadd.f32 %v254_v49, %v145_v50 }
 0x115   :  { %v154_v52 = vmax.f32 %v146_v51, 0.0 }
 0x117   :  { %193 = vmatmul.f32.vlgmr.msrb.gmra.mxu0 %v154_v52 }
 0x120   :  { %v148_v53 = vpop.f32.mrf.mxu3 }
 0x121   :  { %v149_v54 = vadd.f32 %v254_v49, %v148_v53 }
 0x123   :  { %v155_v55 = vmax.f32 %v149_v54, 0.0 }
 0x125   :  { %196 = vmatmul.f32.vlgmr.msra.gmra.mxu2 %v155_v55 }
 0x128   :  { %v151_v56 = vpop.f32.mrf.mxu3 }
 0x129   :  { %v152_v57 = vadd.f32 %v254_v49, %v151_v56 }
 0x12b   :  { %v156_v58 = vmax.f32 %v152_v57, 0.0 }
 0x12d   :  { %199 = vmatmul.f32.gmra.mxu2 %v156_v58 }
 0x194   :  { %v194_v60 = vpop.f32.mrf.mxu0 }
 0x195   :  { %v195_v61 = vadd.f32 %v255_v59, %v194_v60 }
 0x197   :  { %204 = vst.msk [vmem:[%s482_s7] sm:$0xff] %vm203_vm1, %v195_v61 }
 0x1a8   :  { %v197_v62 = vpop.f32.mrf.mxu2 }
 0x1a9   :  { %v198_v63 = vadd.f32 %v255_v59, %v197_v62 }
 0x1ab   :  { %205 = vst.msk [vmem:[%s482_s7 + $0x8] sm:$0xff] %vm203_vm1, %v198_v63 }
 0x1b0   :  { %v200_v0 = vpop.f32.mrf.mxu2 }
 0x1b1   :  { %v201_v1 = vadd.f32 %v255_v59, %v200_v0 }
 0x1b3   :  { %207 = vst.msk [vmem:[%s482_s7 + $0x10] sm:$0xf] %vm206_vm2, %v201_v1 }
 0x1b4   :  { %212 = vsyncpa [#allocation3], 1 }
 0x1b5   :  { %213 = vsyncpa [#allocation5], 1 }

</bundles_post_ra>
